<compile_context>
chip_gen: v7x
topology: tpu7x:2x2x1
jax: 0.10.0
libtpu: 0.0.40
codegen_flags: <defaults>
</compile_context>

<pallas_src>
import functools
import math

import jax
import jax.numpy as jnp
from jax.experimental import pallas as pl
from jax.experimental.pallas import tpu as pltpu


def make_positional_encoding(max_len, d_model, dtype=jnp.float32):
    """Builds the same pe table as the PyTorch module __init__."""
    assert d_model % 2 == 0, "d_model must be even (as in the torch module)"
    position = jnp.arange(max_len, dtype=jnp.float32)[:, None]            # (L, 1)
    div_term = jnp.exp(
        jnp.arange(0, d_model, 2, dtype=jnp.float32)
        * (-(math.log(10000.0) / d_model)))                               # (D/2,)
    ang = position * div_term                                             # (L, D/2)
    pe = jnp.zeros((max_len, d_model), jnp.float32)
    pe = pe.at[:, 0::2].set(jnp.sin(ang))
    pe = pe.at[:, 1::2].set(jnp.cos(ang))
    return pe.astype(dtype)


def _splitmix32(x):
    """Stateless 32-bit integer mixer (uint32 in, uint32 out)."""
    x = x + jnp.uint32(0x9E3779B9)
    x = (x ^ jax.lax.shift_right_logical(x, jnp.uint32(16))) * jnp.uint32(0x85EBCA6B)
    x = (x ^ jax.lax.shift_right_logical(x, jnp.uint32(13))) * jnp.uint32(0xC2B2AE35)
    x = x ^ jax.lax.shift_right_logical(x, jnp.uint32(16))
    return x


def _pe_add_dropout_kernel(seed_ref, x_ref, pe_ref, o_ref, *, p, seq_len):
    # x_ref, pe_ref, o_ref: (seq_tile, d_model); the batch dim is squeezed out.
    y = x_ref[...].astype(jnp.float32) + pe_ref[...].astype(jnp.float32)
    if p > 0.0:
        s = pl.program_id(0)
        b = pl.program_id(1)
        ts, d = x_ref.shape
        # Global element index (wraps mod 2^32; only used for hashing).
        row = jax.lax.broadcasted_iota(jnp.int32, (ts, d), 0).astype(jnp.uint32)
        col = jax.lax.broadcasted_iota(jnp.int32, (ts, d), 1).astype(jnp.uint32)
        row_base = (b * seq_len + s * ts).astype(jnp.uint32)
        gidx = (row_base + row) * jnp.uint32(d) + col
        seed_u = seed_ref[0].astype(jnp.uint32)
        bits = _splitmix32(gidx ^ (seed_u * jnp.uint32(0x9E3779B9)))
        # Drop with probability p: keep iff bits >= floor(p * 2^32).
        thresh = jnp.uint32(min(int(p * 4294967296.0), 4294967295))
        keep = bits >= thresh
        y = jnp.where(keep, y * jnp.float32(1.0 / (1.0 - p)), jnp.float32(0.0))
    o_ref[...] = y.astype(o_ref.dtype)


def _pick_seq_tile(seq_len, d_model, itemsize,
                   target_block_bytes=2 * 1024 * 1024, max_rows=1024):
    """Pick a seq tile so each block is ~2 MiB (multiple of 8 rows)."""
    rows = target_block_bytes // max(1, d_model * itemsize)
    rows = int(max(8, min(max_rows, rows)))
    rows = (rows // 8) * 8
    if rows >= seq_len:
        return seq_len  # full dim is always a legal block extent
    return rows


def positional_encoding_forward(x, pe, *, dropout_p=0.0, seed=0):
    """x: (B, S, D); pe: (max_len, D) with max_len >= S. Returns same shape/dtype."""
    assert 0.0 <= float(dropout_p) < 1.0
    B, S, D = x.shape
    assert pe.shape[0] >= S and pe.shape[1] == D
    pe_s = pe[:S]  # (S, D) — same as pe[:, :x.size(1)] in the module

    itemsize = jnp.dtype(x.dtype).itemsize
    ts = _pick_seq_tile(S, D, itemsize)
    # Keep at least 2 grid steps so both megacore TensorCores get work.
    if B * pl.cdiv(S, ts) < 2 and S >= 16:
        ts = max(8, (((S + 1) // 2 + 7) // 8) * 8)

    grid = (pl.cdiv(S, ts), B)  # batch is the fastest axis -> pe block is reused

    block_bytes = ts * D * itemsize
    # 2x double-buffered input + 2x output + 2x pe blocks, plus headroom.
    vmem_limit = int(min(48 * 2**20, max(32 * 2**20, 6 * block_bytes + 4 * 2**20)))

    kernel = functools.partial(
        _pe_add_dropout_kernel, p=float(dropout_p), seq_len=S)
    seed_arr = jnp.asarray([seed], dtype=jnp.int32)

    out = pl.pallas_call(
        kernel,
        out_shape=jax.ShapeDtypeStruct((B, S, D), x.dtype),
        grid_spec=pltpu.PrefetchScalarGridSpec(
            num_scalar_prefetch=0,
            grid=grid,
            in_specs=[
                pl.BlockSpec(memory_space=pltpu.MemorySpace.SMEM),       # seed
                pl.BlockSpec((None, ts, D), lambda s, b: (b, s, 0)),     # x
                pl.BlockSpec((ts, D), lambda s, b: (s, 0)),              # pe
            ],
            out_specs=pl.BlockSpec((None, ts, D), lambda s, b: (b, s, 0)),
        ),
        compiler_params=pltpu.CompilerParams(
            dimension_semantics=("parallel", "parallel"),
            vmem_limit_bytes=vmem_limit,
        ),
    )(seed_arr, x, pe_s)
    return out


if __name__ == "__main__":
    key = jax.random.PRNGKey(0)
    batch, seq, d_model = 2, 8, 32
    x = jax.random.normal(key, (batch, seq, d_model), dtype=jnp.float32)

    # pe buffer exactly as the module builds it (max_len=5000 default)
    pe = make_positional_encoding(5000, d_model)

    # 1) dropout_p = 0.0 (eval-style): exact check against x + pe[:seq]
    out = positional_encoding_forward(x, pe, dropout_p=0.0)
    out = jax.block_until_ready(out)
    ref = x + pe[:seq][None, :, :]
    assert jnp.allclose(out, ref, atol=1e-6, rtol=1e-6), "p=0 mismatch"

    # 2) dropout_p = 0.1 (train-style): every element must be either 0 or
    #    ref / (1 - p) (inverted dropout).
    p = 0.1
    out_d = positional_encoding_forward(x, pe, dropout_p=p, seed=42)
    out_d = jax.block_until_ready(out_d)
    scaled = ref / (1.0 - p)
    structural_err = jnp.minimum(jnp.abs(out_d), jnp.abs(out_d - scaled))
    assert float(jnp.max(structural_err)) < 1e-4, "dropout structure mismatch"

    print("KERNEL_OK")
</pallas_src>

<mosaic_0001>
module attributes {stable_mosaic.version = 11 : i64} {
  func.func @_pe_add_dropout_kernel(%arg0: i32, %arg1: i32, %arg2: memref<1xi32, #tpu.memory_space<smem>>, %arg3: memref<1x8x32xf32, #tpu.memory_space<vmem>>, %arg4: memref<8x32xf32, #tpu.memory_space<vmem>>, %arg5: memref<1x8x32xf32, #tpu.memory_space<vmem>>) attributes {dimension_semantics = [#tpu.dimension_semantics<parallel>, #tpu.dimension_semantics<parallel>], iteration_bounds = array<i64: 1, 2>, scalar_prefetch = 0 : i64, scratch_operands = 0 : i64, tpu.core_type = #tpu.core_type<tc>, window_params = [{transform_indices = @transform_0, window_bounds = array<i64: 1>}, {transform_indices = @transform_1, window_bounds = array<i64: 1, 8, 32>}, {transform_indices = @transform_2, window_bounds = array<i64: 8, 32>}, {transform_indices = @transform_3, window_bounds = array<i64: 1, 8, 32>}]} {
    %c0 = arith.constant 0 : index
    %c0_0 = arith.constant 0 : index
    %c0_1 = arith.constant 0 : index
    %0 = vector.load %arg3[%c0, %c0_0, %c0_1] : memref<1x8x32xf32, #tpu.memory_space<vmem>>, vector<1x8x32xf32>
    %1 = vector.shape_cast %0 : vector<1x8x32xf32> to vector<8x32xf32>
    %c0_2 = arith.constant 0 : index
    %c0_3 = arith.constant 0 : index
    %2 = vector.load %arg4[%c0_2, %c0_3] : memref<8x32xf32, #tpu.memory_space<vmem>>, vector<8x32xf32>
    %3 = arith.addf %1, %2 : vector<8x32xf32>
    %c0_4 = arith.constant 0 : index
    %c0_5 = arith.constant 0 : index
    %c0_6 = arith.constant 0 : index
    %4 = vector.load %arg5[%c0_4, %c0_5, %c0_6] : memref<1x8x32xf32, #tpu.memory_space<vmem>>, vector<1x8x32xf32>
    %5 = vector.shape_cast %4 : vector<1x8x32xf32> to vector<8x32xf32>
    %6 = vector.shape_cast %3 : vector<8x32xf32> to vector<1x8x32xf32>
    tpu.vector_store %arg5[%c0_4, %c0_5, %c0_6], %6 {strides = array<i32>} : memref<1x8x32xf32, #tpu.memory_space<vmem>>, vector<1x8x32xf32>,
    return
  }
  func.func @transform_0(%arg0: i32, %arg1: i32) -> i32 {
    %c0_i32 = arith.constant 0 : i32
    %c0_i32_0 = arith.constant 0 : i32
    return %c0_i32 : i32
  }
  func.func @transform_1(%arg0: i32, %arg1: i32) -> (i32, i32, i32) {
    %c0_i32 = arith.constant 0 : i32
    %c0_i32_0 = arith.constant 0 : i32
    return %arg1, %arg0, %c0_i32 : i32, i32, i32
  }
  func.func @transform_2(%arg0: i32, %arg1: i32) -> (i32, i32) {
    %c0_i32 = arith.constant 0 : i32
    %c0_i32_0 = arith.constant 0 : i32
    return %arg0, %c0_i32 : i32, i32
  }
  func.func @transform_3(%arg0: i32, %arg1: i32) -> (i32, i32, i32) {
    %c0_i32 = arith.constant 0 : i32
    %c0_i32_0 = arith.constant 0 : i32
    return %arg1, %arg0, %c0_i32 : i32, i32, i32
  }
}

</mosaic_0001>

<bundles_post_ra>
// kernel: tpu_custom_call.1
= control target key start
LH: loop header
LB: loop body
LE: loop exit
PB: predicated region body
PF: predicated region fallthrough
CT: control target
= control target key end

     0   :  { %9 = vsyncpa [#allocation4], 0  ;;  %s809_s0 = inlined_call_operand.<no memory space> [shape: s32[1], index: 0, kind: input, shape index: {}]   ;;  %s810_s1 = inlined_call_operand.hbm [shape: f32[2,8,32], index: 1, kind: input, shape index: {}]   ;;  %s811_s2 = inlined_call_operand.hbm [shape: f32[8,32], index: 2, kind: input, shape index: {}]   ;;  %s812_s3 = inlined_call_operand.hbm [shape: f32[2,8,32], index: 3, kind: output, shape index: {}]  }
   0x1   :  { %11 = vsyncpa [#allocation4 + $0x1], 0 }
   0x2   :  { %12 = vsyncpa [#allocation7], 0 }
   0x3   :  { %13 = vsyncpa [#allocation5], 0 }
   0x4   :  { %15 = vsyncpa [#allocation5 + $0x1], 0  ;;  %s593_s12 = smov 0   ;;  %s595_s13 = smov 0  }
   0x5   :  { %s597_s14 = smov 0   ;;  %s599_s0 = smov 0  }
   0x6   :  { %s601_s15 = smov 0   ;;  %s603_s16 = smov 0  }
   0x7 LB: > { %s336_s17 = sadd.s32 4294967295, %s568_s16   ;;  %s337_s18 = sadd.s32 4294967294, %s568_s16   ;;  %s568_s16 = sphi %s603_s16, %s21_s16   ;;  %s564_s15 = sphi %s601_s15, %s837_s15   ;;  %s560_s0 = sphi %s599_s0, %s836_s0   ;;  %s556_s14 = sphi %s597_s14, %s835_s14   ;;  %s552_s13 = sphi %s595_s13, %s834_s13   ;;  %s548_s12 = sphi %s593_s12, %s833_s12  }
   0x8   : > { %p76_p0 = scmp.ne.s32.totalorder %s552_s13, %s548_s12  ;;  %p627_p1 = scmp.eq.s32.totalorder %s336_s17, 0 }
   0x9   : > { %p631_p2 = scmp.eq.s32.totalorder %s336_s17, 1  ;;  %p134_p3 = scmp.eq.s32.totalorder %s337_s18, 1 }
   0xa   : > { %s817_s19 = scalar_select %p627_p1, 1, 0 }
   0xb   : > { %s818_s20 = scalar_select %p631_p2, 1, 0 }
   0xc   : > { %p637_p4 = por %p627_p1, %p76_p0  ;;  %p338_p5 = scmp.ge.s32.totalorder %s568_s16, 1 }
   0xd   : > { %p642_p6 = por %p134_p3, %p76_p0  ;;  %p141_p7 = scmp.lt.s32.totalorder %s568_s16, 3 }
   0xe   : > { %s819_s21 = scalar_select %p637_p4, 1, 0 }
   0xf   : > { %s820_s22 = scalar_select %p642_p6, 1, 0 }
  0x10   : > { %p647_p8 = pnand %p338_p5, %p141_p7  ;;  %s570_s24 = smov [#allocation6]  }
  0x11   : > { %s159_s25 = sshll.u32 %s570_s24, 4  ;;  %s30_s27 = sadd.s32 1, %s564_s15  ;;  %s160_s25 = int_to_ptr.vmem [resolvable:$true] %s159_s25 }
  0x12   : > { %s821_s23 = scalar_select %p647_p8, 1, 0 }
  0x13   : > { %p359_p10 = pneg %p647_p8  ;;  %s63_s28 = sadd.s32 1, %s556_s14 }
  0x14   : > { %p662_p12 = scmp.ge.s32.totalorder %s30_s27, 2  ;;  %s424_s5 = scalar_lea.hbm %s811_s2, 128 }
  0x15   : > { %p656_p11 = pnand %p359_p10, %p627_p1  ;;  %p425_p13 = scmp.ne.s32.totalorder %s811_s2, %s424_s5 }
  0x16   : > { %s823_s29 = scalar_select %p662_p12, 1, 0 }
  0x17   : > { %p426_p0 = pneg %p656_p11  ;;  %p431_p7 = scmp.lt.u32.totalorder %s424_s5, %s811_s2 }
  0x19   : > { %p427_p3 = pnand %p426_p0, %p425_p13 }
  0x1b   : > { %p428_p5 = pneg %p427_p3 }
  0x1d   : > { %p433_p10 = pnand %p431_p7, %p428_p5 }
  0x1f   : > { %436 = shalt.err (!%p433_p10)
}
  0x20   : > { %s437_s10 = scalar_lea.vmem %s160_s25, 128  ;;  %p445_p4 = scmp.lt.s32.totalorder %s160_s25, %s160_s25 }
  0x21   : > { %p438_p9 = scmp.ne.s32.totalorder %s160_s25, %s437_s10  ;;  %p446_p8 = scmp.lt.s32.totalorder %s437_s10, %s437_s10 }
  0x23   : > { %p440_p6 = pnand %p438_p9, %p426_p0  ;;  %p447_p2 = por %p446_p8, %p445_p4 }
  0x25   : > { %p441_p1 = pneg %p440_p6 }
  0x27   : > { %p448_p12 = pnand %p447_p2, %p441_p1 }
  0x29   : > { %451 = shalt.err (!%p448_p12)
}
  0x2a   : > { %362 = dma.hbm_to_vmem [thread:$0]  (!%p656_p11), %s811_s2, 128, %s160_s25, [#allocation7]  }
  0x2b   : > { %p824_p4 = scmp.ne.s32.totalorder %s823_s29, 0  ;;  %p70_p1 = scmp.ne.s32.totalorder %s556_s14, %s552_s13 }
  0x2c   : > { %p71_p2 = scmp.eq.s32.totalorder %s568_s16, 0  ;;  %p372_p6 = scmp.lt.s32.totalorder %s568_s16, 2 }
  0x2d   : > { %s839_s27 = smov (%p824_p4, %s30_s27), 0  ;;  %p825_p12 = scmp.ne.s32.totalorder %s818_s20, 0 }
  0x2e   : > { %s58_s18 = ssub.s32 %s564_s15, %s839_s27  ;;  %p72_p9 = por %p71_p2, %p70_p1 }
  0x2f   : > { %p61_p8 = scmp.eq.s32.totalorder %s58_s18, 0  ;;  %p694_p13 = por %p825_p12, %p70_p1 }
  0x30   : > { %s170_s26 = sand.u32 1, %s556_s14   ;;  %s342_s29 = sshll.u32 %s564_s15, 7 }
  0x31   : > { %s702_s30 = scalar_select %p61_p8, %s556_s14, %s63_s28  }
  0x32   : > { %s341_s25 = sshll.u32 %s170_s26, 3  ;;  %s708_s6 = scalar_lea.hbm %s810_s1, %s342_s29 }
  0x33   : > { %s174_s20 = scalar_lea.vmem [#allocation3], %s341_s25  ;;  %p712_p11 = pnand %p372_p6, %p72_p9 }
  0x34   : > { %s182_s7 = sshll.u32 %s174_s20, 4  ;;  %s171_s28 = scalar_lea.sflag [#allocation4], %s170_s26  ;;  %s710_s7 = int_to_ptr.vmem [resolvable:$true] %s182_s7 }
  0x35   : > { %s452_s9 = scalar_lea.hbm %s708_s6, 128  ;;  %p454_p3 = pneg %p712_p11 }
  0x36   : > { %p453_p0 = scmp.ne.s32.totalorder %s708_s6, %s452_s9  ;;  %s457_s17 = scalar_lea.hbm %s810_s1, 256 }
  0x37   : > { %p458_p10 = scmp.lt.u32.totalorder %s708_s6, %s810_s1  ;;  %p459_p4 = scmp.lt.u32.totalorder %s457_s17, %s452_s9 }
  0x38   : > { %p455_p5 = pnand %p454_p3, %p453_p0  ;;  %p461_p2 = scmp.lt.u32.totalorder %s452_s9, %s708_s6 }
  0x39   : > { %p460_p1 = por %p459_p4, %p458_p10 }
  0x3a   : > { %p456_p7 = pneg %p455_p5 }
  0x3b   : > { %p462_p6 = por %p461_p2, %p460_p1 }
  0x3d   : > { %p463_p8 = pnand %p462_p6, %p456_p7 }
  0x3f   : > { %466 = shalt.err (!%p463_p8)
}
  0x40   : > { %s467_s26 = scalar_lea.vmem %s710_s7, 128  ;;  %s571_s29 = smov [#allocation3]  }
  0x41   : > { %p468_p9 = scmp.ne.s32.totalorder %s710_s7, %s467_s26  ;;  %s472_s4 = sshll.u32 %s571_s29, 4  ;;  %s473_s4 = int_to_ptr.vmem [resolvable:$false] %s472_s4 }
  0x42   : > { %s474_s5 = scalar_lea.vmem %s473_s4, 256  ;;  %p475_p5 = scmp.lt.s32.totalorder %s710_s7, %s473_s4 }
  0x43   : > { %p470_p12 = pnand %p468_p9, %p454_p3  ;;  %p476_p10 = scmp.lt.s32.totalorder %s474_s5, %s467_s26 }
  0x45   : > { %p471_p0 = pneg %p470_p12  ;;  %p477_p4 = por %p476_p10, %p475_p5 }
  0x47   : > { %p478_p1 = pnand %p477_p4, %p471_p0 }
  0x49   : > { %481 = shalt.err (!%p478_p1)
}
  0x4a   : > { %366 = dma.hbm_to_vmem [thread:$0]  (!%p712_p11), %s708_s6, 128, %s710_s7, %s171_s28  }
  0x4b   : > { %p828_p7 = scmp.ne.s32.totalorder %s821_s23, 0 }
  0x4c   : > { %s744_s20 = sand.u32 (!%p828_p7), 1, %s552_s13   ;;  %p829_p3 = scmp.ne.s32.totalorder (!%p828_p7), %s819_s21, 0 }
  0x4d   : > { %191 = sbr.rel (%p828_p7) target bundleno = 113 (0x71), region = 32  ;;  %s344_s9 = sshll.u32 (!%p828_p7), %s744_s20, 3 }
  0x4e   : > { %s194_s10 = scalar_lea.sflag (!%p828_p7), [#allocation4], %s744_s20  ;;  %s197_s11 = scalar_lea.vmem (!%p828_p7), [#allocation3], %s344_s9 }
  0x54   : > { %535 = dma.done.wait (%p829_p3), %s194_s10, 128  }
  0x55   : > { %537 = vsyncadd (%p829_p3), %s194_s10, 4294967168  ;;  %p830_p2 = scmp.ne.s32.totalorder %s817_s19, 0 }
  0x57   : > { %539 = dma.done.wait (%p830_p2), [#allocation7], 128  }
  0x58   : > { %541 = vsyncadd (%p830_p2), [#allocation7], 4294967168  ;;  %s223_s23 = scalar_lea.vmem [#allocation8], %s344_s9  ;;  %s348_s7 = sshll.u32 %s560_s0, 7  ;;  %v224_v0 = vld [vmem:[%s197_s11] sm:$0xff]  ;;  %v225_v1 = vld [vmem:[#allocation6] sm:$0xff] }
  0x59   : > { %s244_s6 = sshll.u32 %s223_s23, 4  ;;  %vm227_vm0 = vcmask 261120   ;;  %v226_v2 = vadd.f32 %v225_v1, %v224_v0  ;;  %s762_s19 = scalar_lea.hbm %s812_s3, %s348_s7  ;;  %s757_s6 = int_to_ptr.vmem [resolvable:$true] %s244_s6 }
  0x5a   : > { %s230_s28 = scalar_lea.sflag [#allocation5], %s744_s20  ;;  %s482_s17 = scalar_lea.vmem %s757_s6, 128 }
  0x5b   : > { %228 = vst.msk [vmem:[%s223_s23] sm:$0xff] %vm227_vm0, %v226_v2  ;;  %p483_p11 = scmp.ne.s32.totalorder %s757_s6, %s482_s17  ;;  %s572_s0 = smov [#allocation8]  }
  0x5c   : > { %s486_s18 = sshll.u32 %s572_s0, 4  ;;  %s487_s18 = int_to_ptr.vmem [resolvable:$false] %s486_s18 }
  0x5d   : > { %p484_p6 = pnand %p483_p11, %p694_p13  ;;  %s488_s25 = scalar_lea.vmem %s487_s18, 256 }
  0x5e   : > { %p489_p9 = scmp.lt.s32.totalorder %s757_s6, %s487_s18  ;;  %p490_p12 = scmp.lt.s32.totalorder %s488_s25, %s482_s17 }
  0x5f   : > { %p485_p8 = pneg %p484_p6 }
  0x60   : > { %p491_p0 = por %p490_p12, %p489_p9 }
  0x62   : > { %p492_p5 = pnand %p491_p0, %p485_p8 }
  0x64   : > { %495 = shalt.err (!%p492_p5)
}
  0x65   : > { %s496_s26 = scalar_lea.hbm %s762_s19, 128  ;;  %s500_s5 = scalar_lea.hbm %s812_s3, 256 }
  0x66   : > { %p497_p10 = scmp.ne.s32.totalorder %s762_s19, %s496_s26  ;;  %p501_p7 = scmp.lt.u32.totalorder %s762_s19, %s812_s3 }
  0x67   : > { %p502_p3 = scmp.lt.u32.totalorder %s500_s5, %s496_s26  ;;  %p504_p11 = scmp.lt.u32.totalorder %s496_s26, %s762_s19 }
  0x68   : > { %p498_p4 = pnand %p497_p10, %p694_p13 }
  0x69   : > { %p503_p2 = por %p502_p3, %p501_p7 }
  0x6a   : > { %p499_p1 = pneg %p498_p4 }
  0x6b   : > { %p505_p6 = por %p504_p11, %p503_p2 }
  0x6d   : > { %p506_p8 = pnand %p505_p6, %p499_p1 }
  0x6f   : > { %509 = shalt.err (!%p506_p8)
}
  0x70   : > { %357 = dma.vmem_to_hbm [thread:$0]  (%p694_p13), %s757_s6, 128, %s762_s19, %s230_s28  }
  0x71 PF: > { %s256_s10 = sand.u32 1, %s548_s12   ;;  %p831_p9 = scmp.ne.s32.totalorder %s820_s22, 0 }
  0x72   : > { %p832_p12 = scmp.ge.s32.totalorder %s568_s16, 2  ;;  %s257_s11 = scalar_lea.sflag [#allocation5], %s256_s10 }
  0x74   : > { %p368_p0 = pnand %p832_p12, %p831_p9 }
  0x76   : > { %543 = dma.done.wait (!%p368_p0), %s257_s11, 128  }
  0x77   : > { %545 = vsyncadd (!%p368_p0), %s257_s11, 4294967168  ;;  %s21_s16 = sadd.s32 1, %s568_s16   ;;  %s833_s12 = smov %s552_s13 }
  0x78   : > { %p18_p5 = scmp.ge.s32.totalorder %s21_s16, 4   ;;  %s834_s13 = smov %s556_s14 }
  0x79   : > { %s835_s14 = smov %s702_s30  ;;  %s836_s0 = smov %s564_s15 }
  0x7a   : > { %s837_s15 = smov %s839_s27  ;;  %20 = sbr.rel (!%p18_p5) target bundleno = 7 (0x7), region = 82 }
  0x81   :  { %262 = vsyncpa [#allocation4], 1 }
  0x82   :  { %264 = vsyncpa [#allocation4 + $0x1], 1 }
  0x83   :  { %265 = vsyncpa [#allocation7], 1 }
  0x84   :  { %266 = vsyncpa [#allocation5], 1 }
  0x85   :  { %268 = vsyncpa [#allocation5 + $0x1], 1 }

</bundles_post_ra>
